<compile_context>
chip_gen: v6e
topology: v6e:2x2x1
jax: 0.10.0
libtpu: 0.0.40
codegen_flags: <defaults>
</compile_context>

<pallas_src>
import jax
import jax.numpy as jnp
from jax.experimental import pallas as pl
from jax.experimental.pallas import tpu as pltpu


# ---------------------------------------------------------------------------
# Kernel: one batch tile
# ---------------------------------------------------------------------------
def dueling_dqn_kernel(x_ref, w1_ref, w2_ref, wh_ref, b_ref, q_ref):
    """fc1 -> relu -> fc2 -> relu -> fused (dueling-folded) head."""
    dot_dtype = w1_ref.dtype            # bf16 or f32; accumulation always f32
    h1_w = w1_ref.shape[1]
    h2_w = w2_ref.shape[1]
    hd_w = wh_ref.shape[1]

    # fc1 + relu
    h1 = jnp.dot(x_ref[...], w1_ref[...], preferred_element_type=jnp.float32)
    h1 = jnp.maximum(h1 + b_ref[0:1, :h1_w], 0.0)
    if dot_dtype != jnp.float32:
        h1 = h1.astype(dot_dtype)

    # fc2 + relu (output columns padded to 128 -> relu(0)=0, harmless)
    h2 = jnp.dot(h1, w2_ref[...], preferred_element_type=jnp.float32)
    h2 = jnp.maximum(h2 + b_ref[1:2, :h2_w], 0.0)
    if dot_dtype != jnp.float32:
        h2 = h2.astype(dot_dtype)

    # fused head: dueling combine is already folded into wh/bh, so this IS q
    q = jnp.dot(h2, wh_ref[...], preferred_element_type=jnp.float32)
    q = q + b_ref[2:3, :hd_w]

    # store only the real action columns (narrow output block)
    q_ref[...] = q[:, :q_ref.shape[1]]


# ---------------------------------------------------------------------------
# One-time parameter preparation (do this at init / target-network update)
# ---------------------------------------------------------------------------
def prepare_params(params, param_dtype=jnp.float32):
    """Pack / pad / fold the raw Linear params into kernel-ready arrays.

    Folds the dueling combine into the head:
        q_j = h2 @ (wv + wa_j - mean_k wa_k) + (bv + ba_j - mean_k ba_k)
    Pads hidden2 -> 128 so h2 is lane-dense, and stacks the three bias rows
    into one resident [3, 128] block.
    """
    w1, b1, w2, b2, wv, bv, wa, ba = params
    state_dim, hidden1 = w1.shape
    hidden2 = w2.shape[1]
    action_dim = wa.shape[1]

    hidden2_pad = 128 * pl.cdiv(hidden2, 128)      # lane-dense h2
    head_pad = 128 * pl.cdiv(action_dim, 128)      # lane-dense head matmul

    # pad fc2 output columns with zeros (relu(0)=0 -> no effect downstream)
    w2p = jnp.zeros((hidden1, hidden2_pad), jnp.float32).at[:, :hidden2].set(w2)
    b2p = jnp.zeros((1, hidden2_pad), jnp.float32).at[:, :hidden2].set(b2)

    # fold the dueling combine into the head weights/biases (exact algebra)
    wa_mean = jnp.mean(wa, axis=1, keepdims=True)          # [hidden2, 1]
    ba_mean = jnp.mean(ba, axis=1, keepdims=True)          # [1, 1]
    wh_real = wv + wa - wa_mean                            # [hidden2, action_dim]
    bh_real = bv + ba - ba_mean                            # [1, action_dim]
    wh = jnp.zeros((hidden2_pad, head_pad), jnp.float32)
    wh = wh.at[:hidden2, :action_dim].set(wh_real)
    bh = jnp.zeros((1, head_pad), jnp.float32).at[:, :action_dim].set(bh_real)

    # one resident bias block [3, W] (f32, added post-accumulation)
    bias_width = max(hidden1, hidden2_pad, head_pad)

    def pad_row(b):
        return jnp.zeros((1, bias_width), jnp.float32).at[:, :b.shape[1]].set(b)

    bstack = jnp.concatenate([pad_row(b1), pad_row(b2p), pad_row(bh)], axis=0)

    return {
        "w1": w1.astype(param_dtype),
        "w2": w2p.astype(param_dtype),
        "wh": wh.astype(param_dtype),
        "bias": bstack,
        "state_dim": state_dim,
        "hidden1": hidden1,
        "hidden2_pad": hidden2_pad,
        "head_pad": head_pad,
        "bias_width": bias_width,
        "action_dim": action_dim,
        "param_dtype": param_dtype,
    }


def _round_up(n, m):
    return m * pl.cdiv(n, m)


# ---------------------------------------------------------------------------
# Forward wrapper
# ---------------------------------------------------------------------------
def dueling_dqn_forward(x, prepared, *, batch_block=512):
    """x: [B, state_dim] float32. Returns q_values: [B, action_dim] float32.

    batch_block: upper bound on the batch tile.  The kernel is overhead-bound,
    not VMEM-bound (even TB=2048 is a few MiB of double-buffered tiles, far
    under v7x's 64 MiB), so bigger tiles = fewer ~0.35 us grid steps.  The
    tile chooser below also guarantees >= 2 balanced tiles when the batch is
    large enough so both v7x TensorCores get work.
    """
    w1c = prepared["w1"]
    w2c = prepared["w2"]
    whc = prepared["wh"]
    bstack = prepared["bias"]
    state_dim = prepared["state_dim"]
    hidden1 = prepared["hidden1"]
    hidden2_pad = prepared["hidden2_pad"]
    head_pad = prepared["head_pad"]
    bias_width = prepared["bias_width"]
    action_dim = prepared["action_dim"]
    param_dtype = prepared["param_dtype"]

    batch = x.shape[0]

    # pick the batch tile: multiple of 8, capped by batch_block, and split the
    # (padded) batch into >= 2 tiles so v7x megacore parallelism has work.
    tb = min(batch_block, max(8, _round_up(pl.cdiv(_round_up(batch, 8), 2), 8)))
    batch_pad = _round_up(batch, tb)

    xc = x.astype(param_dtype)
    if batch_pad != batch:
        xc = jnp.pad(xc, ((0, batch_pad - batch), (0, 0)))

    grid = (batch_pad // tb,)

    def resident(shape):
        # same block every grid step -> stays resident in VMEM
        return pl.BlockSpec(shape, lambda i: (0, 0))

    q_pad = pl.pallas_call(
        dueling_dqn_kernel,
        out_shape=jax.ShapeDtypeStruct((batch_pad, action_dim), jnp.float32),
        grid=grid,
        in_specs=[
            pl.BlockSpec((tb, state_dim), lambda i: (i, 0)),   # x: tiled over batch
            resident((state_dim, hidden1)),                    # w1
            resident((hidden1, hidden2_pad)),                  # w2 (padded)
            resident((hidden2_pad, head_pad)),                 # fused+folded head
            resident((3, bias_width)),                         # stacked biases (f32)
        ],
        out_specs=pl.BlockSpec((tb, action_dim), lambda i: (i, 0)),
        compiler_params=pltpu.CompilerParams(
            dimension_semantics=("parallel",)),                # megacore on v7x
    )(xc, w1c, w2c, whc, bstack)

    return q_pad[:batch]


def dueling_dqn_apply(x, params, prepared=None, *, small_batch_threshold=8, **kwargs):
    """Dispatch: tiny action-selection batches go to plain XLA (pallas_call
    fixed overhead dominates below ~8 rows); replay-sized batches use the kernel."""
    if x.shape[0] <= small_batch_threshold:
        return reference_forward(x, params)
    if prepared is None:
        prepared = prepare_params(params)
    return dueling_dqn_forward(x, prepared, **kwargs)


# ---------------------------------------------------------------------------
# Param init + reference
# ---------------------------------------------------------------------------
def init_params(key, state_dim, action_dim):
    """PyTorch-style uniform(-1/sqrt(fan_in), 1/sqrt(fan_in)) init.

    Weights stored as [in, out] (transposed vs. torch) so the kernel computes
    x @ W directly; biases as [1, out] rows.
    """
    def linear(key, fan_in, fan_out):
        kw, kb = jax.random.split(key)
        bound = 1.0 / jnp.sqrt(float(fan_in))
        w = jax.random.uniform(kw, (fan_in, fan_out), jnp.float32, -bound, bound)
        b = jax.random.uniform(kb, (1, fan_out), jnp.float32, -bound, bound)
        return w, b

    k1, k2, k3, k4 = jax.random.split(key, 4)
    w1, b1 = linear(k1, state_dim, 128)
    w2, b2 = linear(k2, 128, 64)
    wv, bv = linear(k3, 64, 1)
    wa, ba = linear(k4, 64, action_dim)
    return (w1, b1, w2, b2, wv, bv, wa, ba)


def reference_forward(x, params):
    """Plain-JAX reference (mirrors the PyTorch forward) for validation."""
    w1, b1, w2, b2, wv, bv, wa, ba = params
    h1 = jnp.maximum(x @ w1 + b1, 0.0)
    h2 = jnp.maximum(h1 @ w2 + b2, 0.0)
    v = h2 @ wv + bv
    a = h2 @ wa + ba
    return v + (a - jnp.mean(a, axis=1, keepdims=True))


if __name__ == "__main__":
    STATE_DIM = 8
    ACTION_DIM = 4
    BATCH = 2

    key = jax.random.PRNGKey(0)
    k_params, k_x, k_big = jax.random.split(key, 3)

    params = init_params(k_params, STATE_DIM, ACTION_DIM)

    # --- f32 path, tiny batch (module-spec shapes), single tile ---
    prepared_f32 = prepare_params(params, jnp.float32)
    x = jax.random.normal(k_x, (BATCH, STATE_DIM), dtype=jnp.float32)
    q = jax.block_until_ready(dueling_dqn_forward(x, prepared_f32))
    q_ref = reference_forward(x, params)
    assert q.shape == (BATCH, ACTION_DIM)
    assert jnp.allclose(q, q_ref, atol=1e-4, rtol=1e-4), "f32 mismatch (small batch)"

    # --- replay-sized, non-multiple batch -> multi-tile grid (both TCs on v7x) ---
    x_big = jax.random.normal(k_big, (300, STATE_DIM), dtype=jnp.float32)
    q_big = jax.block_until_ready(
        dueling_dqn_forward(x_big, prepared_f32, batch_block=512))
    q_big_ref = reference_forward(x_big, params)
    assert q_big.shape == (300, ACTION_DIM)
    assert jnp.allclose(q_big, q_big_ref, atol=1e-4, rtol=1e-4), "f32 mismatch (big batch)"

    # --- bf16 weights/activations (fast MXU path on v6e/v7x), f32 accumulation ---
    prepared_bf16 = prepare_params(params, jnp.bfloat16)
    q_bf16 = jax.block_until_ready(
        dueling_dqn_forward(x_big, prepared_bf16, batch_block=512))
    assert jnp.allclose(q_bf16, q_big_ref, atol=5e-2, rtol=5e-2), "bf16 mismatch"

    print("KERNEL_OK")
</pallas_src>

<mosaic_0001>
module attributes {stable_mosaic.version = 11 : i64} {
  func.func @dueling_dqn_kernel(%arg0: i32, %arg1: memref<8x8xf32, #tpu.memory_space<vmem>>, %arg2: memref<8x128xf32, #tpu.memory_space<vmem>>, %arg3: memref<128x128xf32, #tpu.memory_space<vmem>>, %arg4: memref<128x128xf32, #tpu.memory_space<vmem>>, %arg5: memref<3x128xf32, #tpu.memory_space<vmem>>, %arg6: memref<8x4xf32, #tpu.memory_space<vmem>>) attributes {dimension_semantics = [#tpu.dimension_semantics<parallel>], iteration_bounds = array<i64: 1>, scalar_prefetch = 0 : i64, scratch_operands = 0 : i64, tpu.core_type = #tpu.core_type<tc>, window_params = [{transform_indices = @transform_0, window_bounds = array<i64: 8, 8>}, {pipeline_mode = #tpu.pipeline_mode<synchronous>, transform_indices = @transform_1, window_bounds = array<i64: 8, 128>}, {pipeline_mode = #tpu.pipeline_mode<synchronous>, transform_indices = @transform_2, window_bounds = array<i64: 128, 128>}, {pipeline_mode = #tpu.pipeline_mode<synchronous>, transform_indices = @transform_3, window_bounds = array<i64: 128, 128>}, {pipeline_mode = #tpu.pipeline_mode<synchronous>, transform_indices = @transform_4, window_bounds = array<i64: 3, 128>}, {transform_indices = @transform_5, window_bounds = array<i64: 8, 4>}]} {
    %c0 = arith.constant 0 : index
    %c0_0 = arith.constant 0 : index
    %0 = vector.load %arg1[%c0, %c0_0] : memref<8x8xf32, #tpu.memory_space<vmem>>, vector<8x8xf32>
    %c0_1 = arith.constant 0 : index
    %c0_2 = arith.constant 0 : index
    %1 = vector.load %arg2[%c0_1, %c0_2] : memref<8x128xf32, #tpu.memory_space<vmem>>, vector<8x128xf32>
    %cst = arith.constant dense<0.000000e+00> : vector<8x128xf32>
    %2 = tpu.matmul %0, %1, %cst {dimension_numbers = #tpu.dot_dimension_numbers<[1], [0], [0], [1], [0, 0, 1, 1], [], []>} : vector<8x8xf32>, vector<8x128xf32>, vector<8x128xf32> -> vector<8x128xf32>
    %c0_3 = arith.constant 0 : index
    %c0_4 = arith.constant 0 : index
    %3 = vector.load %arg5[%c0_3, %c0_4] : memref<3x128xf32, #tpu.memory_space<vmem>>, vector<1x128xf32>
    %4 = vector.broadcast %3 : vector<1x128xf32> to vector<8x128xf32>
    %5 = arith.addf %2, %4 : vector<8x128xf32>
    %cst_5 = arith.constant 0.000000e+00 : f32
    %6 = vector.broadcast %cst_5 : f32 to vector<8x128xf32>
    %7 = arith.maximumf %5, %6 : vector<8x128xf32>
    %c0_6 = arith.constant 0 : index
    %c0_7 = arith.constant 0 : index
    %8 = vector.load %arg3[%c0_6, %c0_7] : memref<128x128xf32, #tpu.memory_space<vmem>>, vector<128x128xf32>
    %cst_8 = arith.constant dense<0.000000e+00> : vector<8x128xf32>
    %9 = tpu.matmul %7, %8, %cst_8 {dimension_numbers = #tpu.dot_dimension_numbers<[1], [0], [0], [1], [0, 0, 1, 1], [], []>} : vector<8x128xf32>, vector<128x128xf32>, vector<8x128xf32> -> vector<8x128xf32>
    %c1 = arith.constant 1 : index
    %c0_9 = arith.constant 0 : index
    %10 = vector.load %arg5[%c1, %c0_9] : memref<3x128xf32, #tpu.memory_space<vmem>>, vector<1x128xf32>
    %11 = vector.broadcast %10 : vector<1x128xf32> to vector<8x128xf32>
    %12 = arith.addf %9, %11 : vector<8x128xf32>
    %cst_10 = arith.constant 0.000000e+00 : f32
    %13 = vector.broadcast %cst_10 : f32 to vector<8x128xf32>
    %14 = arith.maximumf %12, %13 : vector<8x128xf32>
    %c0_11 = arith.constant 0 : index
    %c0_12 = arith.constant 0 : index
    %15 = vector.load %arg4[%c0_11, %c0_12] : memref<128x128xf32, #tpu.memory_space<vmem>>, vector<128x128xf32>
    %cst_13 = arith.constant dense<0.000000e+00> : vector<8x128xf32>
    %16 = tpu.matmul %14, %15, %cst_13 {dimension_numbers = #tpu.dot_dimension_numbers<[1], [0], [0], [1], [0, 0, 1, 1], [], []>} : vector<8x128xf32>, vector<128x128xf32>, vector<8x128xf32> -> vector<8x128xf32>
    %c2 = arith.constant 2 : index
    %c0_14 = arith.constant 0 : index
    %17 = vector.load %arg5[%c2, %c0_14] : memref<3x128xf32, #tpu.memory_space<vmem>>, vector<1x128xf32>
    %18 = vector.broadcast %17 : vector<1x128xf32> to vector<8x128xf32>
    %19 = arith.addf %16, %18 : vector<8x128xf32>
    %20 = vector.extract_strided_slice %19 {offsets = [0, 0], sizes = [8, 4], strides = [1, 1]} : vector<8x128xf32> to vector<8x4xf32>
    %c0_15 = arith.constant 0 : index
    %c0_16 = arith.constant 0 : index
    %21 = vector.load %arg6[%c0_15, %c0_16] : memref<8x4xf32, #tpu.memory_space<vmem>>, vector<8x4xf32>
    tpu.vector_store %arg6[%c0_15, %c0_16], %20 {strides = array<i32>} : memref<8x4xf32, #tpu.memory_space<vmem>>, vector<8x4xf32>,
    return
  }
  func.func @transform_0(%arg0: i32) -> (i32, i32) {
    %c0_i32 = arith.constant 0 : i32
    %c0_i32_0 = arith.constant 0 : i32
    return %arg0, %c0_i32 : i32, i32
  }
  func.func @transform_1(%arg0: i32) -> (i32, i32) {
    %c0_i32 = arith.constant 0 : i32
    %c0_i32_0 = arith.constant 0 : i32
    %c0_i32_1 = arith.constant 0 : i32
    return %c0_i32, %c0_i32_0 : i32, i32
  }
  func.func @transform_2(%arg0: i32) -> (i32, i32) {
    %c0_i32 = arith.constant 0 : i32
    %c0_i32_0 = arith.constant 0 : i32
    %c0_i32_1 = arith.constant 0 : i32
    return %c0_i32, %c0_i32_0 : i32, i32
  }
  func.func @transform_3(%arg0: i32) -> (i32, i32) {
    %c0_i32 = arith.constant 0 : i32
    %c0_i32_0 = arith.constant 0 : i32
    %c0_i32_1 = arith.constant 0 : i32
    return %c0_i32, %c0_i32_0 : i32, i32
  }
  func.func @transform_4(%arg0: i32) -> (i32, i32) {
    %c0_i32 = arith.constant 0 : i32
    %c0_i32_0 = arith.constant 0 : i32
    %c0_i32_1 = arith.constant 0 : i32
    return %c0_i32, %c0_i32_0 : i32, i32
  }
  func.func @transform_5(%arg0: i32) -> (i32, i32) {
    %c0_i32 = arith.constant 0 : i32
    %c0_i32_0 = arith.constant 0 : i32
    return %arg0, %c0_i32 : i32, i32
  }
}

</mosaic_0001>

<bundles_post_ra>
// kernel: tpu_custom_call.1
= control target key start
LH: loop header
LB: loop body
LE: loop exit
PB: predicated region body
PF: predicated region fallthrough
CT: control target
= control target key end

     0   :  { %10 = vsyncpa [#allocation3], 0  ;;  %s655_s0 = inlined_call_operand.hbm [shape: f32[8,8], index: 0, kind: input, shape index: {}]   ;;  %s656_s1 = inlined_call_operand.hbm [shape: f32[8,128], index: 1, kind: input, shape index: {}]   ;;  %s657_s2 = inlined_call_operand.hbm [shape: f32[128,128], index: 2, kind: input, shape index: {}]   ;;  %s658_s3 = inlined_call_operand.hbm [shape: f32[128,128], index: 3, kind: input, shape index: {}]   ;;  %s659_s4 = inlined_call_operand.vmem [shape: f32[3,128], index: 4, kind: input, shape index: {}]   ;;  %s660_s5 = inlined_call_operand.vmem [shape: f32[8,4], index: 5, kind: output, shape index: {}]  }
   0x1   :  { %11 = vsyncpa [#allocation5], 0 }
   0x2   :  { %12 = vsyncpa [#allocation8], 0  ;;  %s554_s18 = smov [#allocation4]   ;;  %s555_s20 = smov [#allocation2]  }
   0x3   :  { %s29_s19 = sshll.u32 %s554_s18, 4  ;;  %s19_s21 = sshll.u32 %s555_s20, 4  ;;  %s30_s19 = int_to_ptr.vmem [resolvable:$true] %s29_s19  ;;  %s20_s21 = int_to_ptr.vmem [resolvable:$true] %s19_s21 }
   0x4   :  { %s476_s22 = scalar_lea.vmem %s30_s19, 128  ;;  %p481_p1 = scmp.lt.s32.totalorder %s30_s19, %s30_s19 }
   0x5   :  { %p477_p0 = scmp.ne.s32.totalorder %s30_s19, %s476_s22  ;;  %p482_p2 = scmp.lt.s32.totalorder %s476_s22, %s476_s22 }
   0x7   :  { %p483_p3 = por %p482_p2, %p481_p1 }
   0x9   :  { %p484_p4 = pnand %p483_p3, %p477_p0 }
   0xb   :  { %487 = shalt.err (!%p484_p4)
}
   0xc   :  { %32 = dma.hbm_to_vmem [thread:$0]  %s656_s1, 128, %s30_s19, [#allocation5]  }
   0xd   :  { %s496_s25 = scalar_lea.vmem %s20_s21, 128  ;;  %p501_p6 = scmp.lt.s32.totalorder %s20_s21, %s20_s21 }
   0xe   :  { %p497_p5 = scmp.ne.s32.totalorder %s20_s21, %s496_s25  ;;  %p502_p7 = scmp.lt.s32.totalorder %s496_s25, %s496_s25 }
  0x10   :  { %p503_p8 = por %p502_p7, %p501_p6 }
  0x12   :  { %p504_p9 = pnand %p503_p8, %p497_p5 }
  0x14   :  { %507 = shalt.err (!%p504_p9)
}
  0x15   :  { %22 = dma.hbm_to_vmem [thread:$0]  %s655_s0, 128, %s20_s21, [#allocation3]  }
  0x16   :  { %s556_s28 = smov [#allocation6]  }
  0x17   :  { %s38_s29 = sshll.u32 %s556_s28, 4  ;;  %s39_s29 = int_to_ptr.vmem [resolvable:$true] %s38_s29 }
  0x18   :  { %s516_s30 = scalar_lea.vmem %s39_s29, 2048  ;;  %p521_p11 = scmp.lt.s32.totalorder %s39_s29, %s39_s29 }
  0x19   :  { %p517_p10 = scmp.ne.s32.totalorder %s39_s29, %s516_s30  ;;  %p522_p12 = scmp.lt.s32.totalorder %s516_s30, %s516_s30 }
  0x1b   :  { %p523_p13 = por %p522_p12, %p521_p11 }
  0x1d   :  { %p524_p0 = pnand %p523_p13, %p517_p10 }
  0x1f   :  { %527 = shalt.err (!%p524_p0)
}
  0x20   :  { %s557_s1 = smov 128   ;;  %s558_s6 = smov 8  }
  0x21   :  { %44 = dma.hbm_to_vmem [thread:$0]  %s657_s2, 2048, %s39_s29, [#allocation5], %s557_s1, %s557_s1, %s558_s6  }
  0x22   :  { %s559_s9 = smov [#allocation7]  }
  0x23   :  { %s50_s10 = sshll.u32 %s559_s9, 4  ;;  %s51_s10 = int_to_ptr.vmem [resolvable:$true] %s50_s10 }
  0x24   :  { %s536_s0 = scalar_lea.vmem %s51_s10, 2048  ;;  %p541_p2 = scmp.lt.s32.totalorder %s51_s10, %s51_s10 }
  0x25   :  { %p537_p1 = scmp.ne.s32.totalorder %s51_s10, %s536_s0  ;;  %p542_p3 = scmp.lt.s32.totalorder %s536_s0, %s536_s0 }
  0x27   :  { %p543_p4 = por %p542_p3, %p541_p2 }
  0x29   :  { %p544_p5 = pnand %p543_p4, %p537_p1 }
  0x2b   :  { %547 = shalt.err (!%p544_p5)
}
  0x2c   :  { %56 = dma.hbm_to_vmem [thread:$0]  %s658_s3, 2048, %s51_s10, [#allocation8], %s557_s1, %s557_s1, %s558_s6  }
  0x2d   :  { %548 = dma.done.wait [#allocation3], 128  }
  0x2e   :  { %549 = vsyncadd [#allocation3], 4294967168 }
  0x2f   :  { %550 = dma.done.wait [#allocation5], 2176  }
  0x30   :  { %551 = vsyncadd [#allocation5], 4294965120 }
  0x31   :  { %552 = dma.done.wait [#allocation8], 2048  }
  0x32   :  { %553 = vsyncadd [#allocation8], 4294965248  ;;  %v560_v0 = vmov 0.0   ;;  %vm561_vm0 = vmmov 0   ;;  %vm78_vm1 = vcmask 64512   ;;  %v72_v1 = vld [vmem:[#allocation4] sm:$0xff] }
  0x33   :  { %385 = vmatprep.subr.mxu0 %v560_v0  ;;  %387 = vmatprep.mubr.msk.f32.mxu0 %vm561_vm0, %v560_v0  ;;  %v71_v2 = vld [vmem:[#allocation2] sm:$0xff]  ;;  %v168_v3 = vld [vmem:[#allocation6 + $0x78] sm:$0xff]  ;;  %v166_v5 = vld [vmem:[#allocation6 + $0x68] sm:$0xff]  ;;  %vm336_vm2 = vcmask 31744  }
  0x34   :  { %390 = vmatprep.subr.mxu1 %v560_v0  ;;  %422 = vmatprep.mubr.msk.f32.mxu1 %vm561_vm0, %v560_v0  ;;  %v167_v4 = vld [vmem:[#allocation6 + $0x70] sm:$0xff]  ;;  %v165_v6 = vld [vmem:[#allocation6 + $0x60] sm:$0xff]  ;;  %v164_v7 = vld [vmem:[#allocation6 + $0x58] sm:$0xff] }
  0x35   :  { %386 = vmatpush3.msra.mxu0 %v72_v1  ;;  %391 = vmatpush3.msra.mxu1 %v168_v3  ;;  %v163_v8 = vld [vmem:[#allocation6 + $0x50] sm:$0xff]  ;;  %v162_v9 = vld [vmem:[#allocation6 + $0x48] sm:$0xff]  ;;  %v161_v10 = vld [vmem:[#allocation6 + $0x40] sm:$0xff] }
  0x36   :  { %388 = vmatmul.mubr.msk.f32.vlgmr.msra.gmra.mxu0 %vm78_vm1, %v71_v2  ;;  %392 = vmatprep.subr.mxu1 %v560_v0  ;;  %v160_v11 = vld [vmem:[#allocation6 + $0x38] sm:$0xff]  ;;  %v159_v12 = vld [vmem:[#allocation6 + $0x30] sm:$0xff]  ;;  %v158_v13 = vld [vmem:[#allocation6 + $0x28] sm:$0xff] }
  0x37   :  { %393 = vmatpush3.msra.mxu1 %v167_v4  ;;  %425 = vmatprep.subr.mxu0 %v560_v0  ;;  %v157_v14 = vld [vmem:[#allocation6 + $0x20] sm:$0xff]  ;;  %v156_v15 = vld [vmem:[#allocation6 + $0x18] sm:$0xff]  ;;  %v155_v16 = vld [vmem:[#allocation6 + $0x10] sm:$0xff] }
  0x38   :  { %394 = vmatprep.subr.mxu1 %v560_v0  ;;  %457 = vmatprep.mubr.msk.f32.mxu0 %vm561_vm0, %v560_v0  ;;  %v154_v17 = vld [vmem:[#allocation6 + $0x8] sm:$0xff]  ;;  %v153_v18 = vld [vmem:[#allocation6] sm:$0xff]  ;;  %v260_v19 = vld [vmem:[#allocation7 + $0x78] sm:$0xff] }
  0x39   :  { %395 = vmatpush3.msra.mxu1 %v166_v5  ;;  %v259_v20 = vld [vmem:[#allocation7 + $0x70] sm:$0xff]  ;;  %426 = vmatpush3.msra.mxu0 %v260_v19  ;;  %v258_v21 = vld [vmem:[#allocation7 + $0x68] sm:$0xff]  ;;  %v257_v22 = vld [vmem:[#allocation7 + $0x60] sm:$0xff] }
  0x3a   :  { %396 = vmatprep.subr.mxu1 %v560_v0  ;;  %427 = vmatprep.subr.mxu0 %v560_v0  ;;  %v256_v23 = vld [vmem:[#allocation7 + $0x58] sm:$0xff]  ;;  %v255_v24 = vld [vmem:[#allocation7 + $0x50] sm:$0xff]  ;;  %v254_v25 = vld [vmem:[#allocation7 + $0x48] sm:$0xff] }
  0x3b   :  { %397 = vmatpush3.msra.mxu1 %v165_v6  ;;  %428 = vmatpush3.msra.mxu0 %v259_v20  ;;  %v253_v26 = vld [vmem:[#allocation7 + $0x40] sm:$0xff]  ;;  %v252_v27 = vld [vmem:[#allocation7 + $0x38] sm:$0xff]  ;;  %v251_v28 = vld [vmem:[#allocation7 + $0x30] sm:$0xff] }
  0x3c   :  { %398 = vmatprep.subr.mxu1 %v560_v0  ;;  %429 = vmatprep.subr.mxu0 %v560_v0  ;;  %v250_v29 = vld [vmem:[#allocation7 + $0x28] sm:$0xff]  ;;  %v249_v30 = vld [vmem:[#allocation7 + $0x20] sm:$0xff]  ;;  %v248_v31 = vld [vmem:[#allocation7 + $0x18] sm:$0xff] }
  0x3d   :  { %399 = vmatpush3.msra.mxu1 %v164_v7  ;;  %430 = vmatpush3.msra.mxu0 %v258_v21  ;;  %v345_v32 = vld [vmem:[%s659_s4] ss:$0 sm:$0xff]  ;;  %v246_v38 = vld [vmem:[#allocation7 + $0x8] sm:$0xff]  ;;  %v245_v39 = vld [vmem:[#allocation7] sm:$0xff] }
  0x3e   :  { %400 = vmatprep.subr.mxu1 %v560_v0  ;;  %431 = vmatprep.subr.mxu0 %v560_v0  ;;  %v247_v37 = vld [vmem:[#allocation7 + $0x10] sm:$0xff] }
  0x3f   :  { %401 = vmatpush3.msra.mxu1 %v163_v8  ;;  %432 = vmatpush3.msra.mxu0 %v257_v22  ;;  %v347_v40 = vld [vmem:[%s659_s4 + $0x1] ss:$0 sm:$0xff]  ;;  %v348_v45 = vld [vmem:[%s659_s4 + $0x2] ss:$0 sm:$0xff] }
  0x40   :  { %402 = vmatprep.subr.mxu1 %v560_v0  ;;  %433 = vmatprep.subr.mxu0 %v560_v0 }
  0x41   :  { %403 = vmatpush3.msra.mxu1 %v162_v9  ;;  %434 = vmatpush3.msra.mxu0 %v256_v23 }
  0x42   :  { %404 = vmatprep.subr.mxu1 %v560_v0  ;;  %435 = vmatprep.subr.mxu0 %v560_v0 }
  0x43   :  { %405 = vmatpush3.msra.mxu1 %v161_v10  ;;  %436 = vmatpush3.msra.mxu0 %v255_v24 }
  0x44   :  { %406 = vmatprep.subr.mxu1 %v560_v0  ;;  %437 = vmatprep.subr.mxu0 %v560_v0 }
  0x45   :  { %407 = vmatpush3.msra.mxu1 %v160_v11  ;;  %438 = vmatpush3.msra.mxu0 %v254_v25 }
  0x46   :  { %408 = vmatprep.subr.mxu1 %v560_v0  ;;  %439 = vmatprep.subr.mxu0 %v560_v0 }
  0x47   :  { %409 = vmatpush3.msra.mxu1 %v159_v12  ;;  %440 = vmatpush3.msra.mxu0 %v253_v26 }
  0x48   :  { %410 = vmatprep.subr.mxu1 %v560_v0  ;;  %441 = vmatprep.subr.mxu0 %v560_v0 }
  0x49   :  { %411 = vmatpush3.msra.mxu1 %v158_v13  ;;  %442 = vmatpush3.msra.mxu0 %v252_v27 }
  0x4a   :  { %412 = vmatprep.subr.mxu1 %v560_v0  ;;  %443 = vmatprep.subr.mxu0 %v560_v0 }
  0x4b   :  { %413 = vmatpush3.msra.mxu1 %v157_v14  ;;  %444 = vmatpush3.msra.mxu0 %v251_v28 }
  0x4c   :  { %414 = vmatprep.subr.mxu1 %v560_v0  ;;  %445 = vmatprep.subr.mxu0 %v560_v0 }
  0x4d   :  { %415 = vmatpush3.msra.mxu1 %v156_v15  ;;  %446 = vmatpush3.msra.mxu0 %v250_v29 }
  0x4e   :  { %416 = vmatprep.subr.mxu1 %v560_v0  ;;  %447 = vmatprep.subr.mxu0 %v560_v0 }
  0x4f   :  { %417 = vmatpush3.msra.mxu1 %v155_v16  ;;  %448 = vmatpush3.msra.mxu0 %v249_v30 }
  0x50   :  { %418 = vmatprep.subr.mxu1 %v560_v0  ;;  %449 = vmatprep.subr.mxu0 %v560_v0 }
  0x51   :  { %419 = vmatpush3.msra.mxu1 %v154_v17  ;;  %450 = vmatpush3.msra.mxu0 %v248_v31 }
  0x52   :  { %420 = vmatprep.subr.mxu1 %v560_v0  ;;  %451 = vmatprep.subr.mxu0 %v560_v0 }
  0x53   :  { %421 = vmatpush3.msra.mxu1 %v153_v18  ;;  %452 = vmatpush3.msra.mxu0 %v247_v37 }
  0x54   :  { %453 = vmatprep.subr.mxu0 %v560_v0 }
  0x55   :  { %454 = vmatpush3.msra.mxu0 %v246_v38 }
  0x56   :  { %455 = vmatprep.subr.mxu0 %v560_v0 }
  0x57   :  { %456 = vmatpush3.msra.mxu0 %v245_v39 }
  0xf6   :  { %v148_v33 = vpop.f32.mrf.mxu0 }
  0xf7   :  { %v149_v34 = vadd.f32 %v345_v32, %v148_v33 }
  0xf8   :  { %v389_v35 = vpop.f32.mrf.mxu0 }
  0xf9   :  { %v152_v36 = vmax.f32 %v149_v34, 0.0 }
  0xfb   :  { %423 = vmatmul.mubr.f32.vlgmr.msra.gmra.mxu1 %v152_v36 }
 0x1bb   :  { %v240_v41 = vpop.f32.mrf.mxu1 }
 0x1bc   :  { %v241_v42 = vadd.f32 %v347_v40, %v240_v41 }
 0x1bd   :  { %v424_v43 = vpop.f32.mrf.mxu1 }
 0x1be   :  { %v244_v44 = vmax.f32 %v241_v42, 0.0 }
 0x1c0   :  { %458 = vmatmul.mubr.f32.vlgmr.msra.gmra.mxu0 %v244_v44 }
 0x280   :  { %v332_v46 = vpop.f32.mrf.mxu0 }
 0x281   :  { %v333_v47 = vadd.f32 %v348_v45, %v332_v46 }
 0x282   :  { %v459_v48 = vpop.f32.mrf.mxu0 }
 0x283   :  { %337 = vst.msk [vmem:[%s660_s5] sm:$0xff] %vm336_vm2, %v333_v47 }
 0x284   :  { %342 = vsyncpa [#allocation3], 1 }
 0x285   :  { %343 = vsyncpa [#allocation5], 1 }
 0x286   :  { %344 = vsyncpa [#allocation8], 1 }

</bundles_post_ra>
